<compile_context>
chip_gen: v7x
topology: tpu7x:2x2x1
jax: 0.10.0
libtpu: 0.0.40
codegen_flags: <defaults>
</compile_context>

<pallas_src>
import functools

import jax
import jax.numpy as jnp
from jax.experimental import pallas as pl
from jax.experimental.pallas import tpu as pltpu


def _round_up(v, m):
    return (v + m - 1) // m * m


def _masked_linear_kernel(means_ref, x_ref, w_ref, mask_ref, bias_ref,
                          o_ref, acc_ref, *, mxu_dtype):
    k = pl.program_id(2)

    @pl.when(k == 0)
    def _():
        acc_ref[...] = jnp.zeros_like(acc_ref)

    # Gating (recomputed per (j, k) weight tile; for multi-batch-tile grids it
    # is recomputed per batch tile as well -- fine while the MXU has slack).
    means = means_ref[0]
    sig = jax.nn.sigmoid(mask_ref[...].astype(jnp.float32))       # EUP
    w = w_ref[...].astype(jnp.float32)
    masked_weight = means + sig * (w - means)                     # (tk, tn)

    # MXU matmul, f32 accumulate. No transpose: weight tile is already (K, N).
    acc_ref[...] += jnp.dot(
        x_ref[...].astype(mxu_dtype),
        masked_weight.astype(mxu_dtype),
        preferred_element_type=jnp.float32)

    @pl.when(k == pl.num_programs(2) - 1)
    def _():
        o_ref[...] = (acc_ref[...] + bias_ref[...].astype(jnp.float32)
                      ).astype(o_ref.dtype)


def masked_linear(x, weight, mask, bias, means, *,
                  tm=None, tn=128, tk=128, mxu_dtype=jnp.float32):
    """x: (B, K); weight/mask: (N, K) (nn.Linear layout); bias: (N,); means: scalar."""
    B, K = x.shape
    N, Kw = weight.shape
    assert K == Kw and mask.shape == (N, K) and bias.shape == (N,)

    # Tile sizes: MXU/lane friendly (tn, tk multiples of 128; tm multiple of 8).
    if tm is None:
        tm = min(256, _round_up(B, 8))
    tm = max(8, _round_up(tm, 8))
    tn = max(128, _round_up(tn, 128))
    tk = max(128, _round_up(tk, 128))

    Bp, Kp, Np = _round_up(B, tm), _round_up(K, tk), _round_up(N, tn)

    # (K, N) layout: N on the lane axis for gated weight, MXU RHS and output.
    wT, mT = weight.T, mask.T
    xp = x if (Bp, Kp) == (B, K) else jnp.pad(x, ((0, Bp - B), (0, Kp - K)))
    wTp = wT if (Kp, Np) == (K, N) else jnp.pad(wT, ((0, Kp - K), (0, Np - N)))
    mTp = mT if (Kp, Np) == (K, N) else jnp.pad(mT, ((0, Kp - K), (0, Np - N)))
    biasp = (bias if Np == N else jnp.pad(bias, (0, Np - N))).reshape(1, Np)

    means_arr = jnp.asarray(means, dtype=jnp.float32).reshape(1)  # SMEM scalar

    grid = (Bp // tm, Np // tn, Kp // tk)

    # VMEM budget: double-buffered x, weight, mask, bias, out tiles + f32 acc.
    itemsize = jnp.dtype(x.dtype).itemsize
    vmem_bytes = (2 * (tm * tk + 2 * tk * tn + tn + tm * tn) * itemsize
                  + tm * tn * 4)
    vmem_limit = int(min(48 << 20, max(vmem_bytes + (4 << 20), 16 << 20)))

    kernel = functools.partial(_masked_linear_kernel, mxu_dtype=mxu_dtype)

    out = pl.pallas_call(
        kernel,
        out_shape=jax.ShapeDtypeStruct((Bp, Np), x.dtype),
        grid_spec=pltpu.PrefetchScalarGridSpec(
            num_scalar_prefetch=1,                       # means -> SMEM
            grid=grid,
            in_specs=[
                pl.BlockSpec((tm, tk), lambda i, j, k, m: (i, k)),   # x
                pl.BlockSpec((tk, tn), lambda i, j, k, m: (k, j)),   # weight (K,N)
                pl.BlockSpec((tk, tn), lambda i, j, k, m: (k, j)),   # mask   (K,N)
                pl.BlockSpec((1, tn),  lambda i, j, k, m: (0, j)),   # bias
            ],
            out_specs=pl.BlockSpec((tm, tn), lambda i, j, k, m: (i, j)),
            scratch_shapes=[pltpu.VMEM((tm, tn), jnp.float32)],
        ),
        compiler_params=pltpu.CompilerParams(
            dimension_semantics=("parallel", "parallel", "arbitrary"),
            vmem_limit_bytes=vmem_limit,
        ),
    )(means_arr, xp, wTp, mTp, biasp)

    return out[:B, :N]


def masked_linear_ref(x, weight, mask, bias, means):
    sig = jax.nn.sigmoid(mask)
    mw = weight * sig + (1.0 - sig) * means
    return x @ mw.T + bias


if __name__ == "__main__":
    key = jax.random.PRNGKey(0)
    k_x, k_w, k_m, k_b, k_x2, k_w2, k_m2, k_b2 = jax.random.split(key, 8)

    # --- Test 1: small MLP-layer shapes (single tile after padding) ---------
    B, K, N = 8, 32, 16
    x = jax.random.normal(k_x, (B, K), dtype=jnp.float32)
    weight = jax.random.normal(k_w, (N, K), dtype=jnp.float32) * 0.1
    bias = jax.random.normal(k_b, (N,), dtype=jnp.float32) * 0.1
    mask = jax.random.uniform(k_m, (N, K), dtype=jnp.float32)
    means = float(jnp.mean(weight))

    out = jax.block_until_ready(masked_linear(x, weight, mask, bias, means))
    ref = masked_linear_ref(x, weight, mask, bias, means)
    assert out.shape == (B, N)
    assert jnp.allclose(out, ref, atol=1e-5, rtol=1e-5)

    # bf16 MXU feed (gating + accumulation stay f32) -- looser tolerance.
    out_bf16 = jax.block_until_ready(
        masked_linear(x, weight, mask, bias, means, mxu_dtype=jnp.bfloat16))
    assert jnp.allclose(out_bf16, ref, atol=3e-2, rtol=3e-2)

    # --- Test 2: multi-tile grid (2,2,2): K-accumulation + padding + bias ---
    B2, K2, N2 = 16, 200, 176
    x2 = jax.random.normal(k_x2, (B2, K2), dtype=jnp.float32)
    weight2 = jax.random.normal(k_w2, (N2, K2), dtype=jnp.float32) * 0.1
    bias2 = jax.random.normal(k_b2, (N2,), dtype=jnp.float32) * 0.1
    mask2 = jax.random.uniform(k_m2, (N2, K2), dtype=jnp.float32)
    means2 = float(jnp.mean(weight2))

    out2 = jax.block_until_ready(
        masked_linear(x2, weight2, mask2, bias2, means2, tm=8, tn=128, tk=128))
    ref2 = masked_linear_ref(x2, weight2, mask2, bias2, means2)
    assert out2.shape == (B2, N2)
    assert jnp.allclose(out2, ref2, atol=1e-4, rtol=1e-4)

    print("KERNEL_OK")
</pallas_src>

<mosaic_0001>
module attributes {stable_mosaic.version = 11 : i64} {
  func.func @_masked_linear_kernel(%arg0: i32, %arg1: i32, %arg2: i32, %arg3: memref<1xf32, #tpu.memory_space<smem>>, %arg4: memref<8x128xf32, #tpu.memory_space<vmem>>, %arg5: memref<128x128xf32, #tpu.memory_space<vmem>>, %arg6: memref<128x128xf32, #tpu.memory_space<vmem>>, %arg7: memref<1x128xf32, #tpu.memory_space<vmem>>, %arg8: memref<8x128xf32, #tpu.memory_space<vmem>>, %arg9: memref<8x128xf32, #tpu.memory_space<vmem>>) attributes {dimension_semantics = [#tpu.dimension_semantics<parallel>, #tpu.dimension_semantics<parallel>, #tpu.dimension_semantics<arbitrary>], iteration_bounds = array<i64: 1, 1, 1>, scalar_prefetch = 1 : i64, scratch_operands = 1 : i64, tpu.core_type = #tpu.core_type<tc>, window_params = [{transform_indices = @transform_0, window_bounds = array<i64: 8, 128>}, {transform_indices = @transform_1, window_bounds = array<i64: 128, 128>}, {transform_indices = @transform_2, window_bounds = array<i64: 128, 128>}, {transform_indices = @transform_3, window_bounds = array<i64: 1, 128>}, {transform_indices = @transform_4, window_bounds = array<i64: 8, 128>}]} {
    %c0_i32 = arith.constant 0 : i32
    %0 = arith.cmpi eq, %arg2, %c0_i32 : i32
    %1 = arith.extui %0 : i1 to i32
    %c0_i32_0 = arith.constant 0 : i32
    %2 = arith.cmpi ne, %1, %c0_i32_0 : i32
    scf.if %2 {
      %cst_14 = arith.constant 0.000000e+00 : f32
      %24 = vector.broadcast %cst_14 : f32 to vector<8x128xf32>
      %c0_15 = arith.constant 0 : index
      %c0_16 = arith.constant 0 : index
      %25 = vector.load %arg9[%c0_15, %c0_16] : memref<8x128xf32, #tpu.memory_space<vmem>>, vector<8x128xf32>
      tpu.vector_store %arg9[%c0_15, %c0_16], %24 {strides = array<i32>} : memref<8x128xf32, #tpu.memory_space<vmem>>, vector<8x128xf32>,
    } else {
    }
    %c0 = arith.constant 0 : index
    %3 = memref.load %arg3[%c0] : memref<1xf32, #tpu.memory_space<smem>>
    %c0_1 = arith.constant 0 : index
    %c0_2 = arith.constant 0 : index
    %4 = vector.load %arg6[%c0_1, %c0_2] : memref<128x128xf32, #tpu.memory_space<vmem>>, vector<128x128xf32>
    %5 = arith.negf %4 : vector<128x128xf32>
    %6 = math.exp %5 : vector<128x128xf32>
    %cst = arith.constant 1.000000e+00 : f32
    %7 = vector.broadcast %cst : f32 to vector<128x128xf32>
    %8 = arith.addf %7, %6 : vector<128x128xf32>
    %9 = arith.divf %7, %8 : vector<128x128xf32>
    %c0_3 = arith.constant 0 : index
    %c0_4 = arith.constant 0 : index
    %10 = vector.load %arg5[%c0_3, %c0_4] : memref<128x128xf32, #tpu.memory_space<vmem>>, vector<128x128xf32>
    %11 = vector.broadcast %3 : f32 to vector<128x128xf32>
    %12 = arith.subf %10, %11 : vector<128x128xf32>
    %13 = arith.mulf %9, %12 : vector<128x128xf32>
    %14 = vector.broadcast %3 : f32 to vector<128x128xf32>
    %15 = arith.addf %14, %13 : vector<128x128xf32>
    %c0_5 = arith.constant 0 : index
    %c0_6 = arith.constant 0 : index
    %16 = vector.load %arg9[%c0_5, %c0_6] : memref<8x128xf32, #tpu.memory_space<vmem>>, vector<8x128xf32>
    %c0_7 = arith.constant 0 : index
    %c0_8 = arith.constant 0 : index
    %17 = vector.load %arg4[%c0_7, %c0_8] : memref<8x128xf32, #tpu.memory_space<vmem>>, vector<8x128xf32>
    %cst_9 = arith.constant dense<0.000000e+00> : vector<8x128xf32>
    %18 = tpu.matmul %17, %15, %cst_9 {dimension_numbers = #tpu.dot_dimension_numbers<[1], [0], [0], [1], [0, 0, 1, 1], [], []>} : vector<8x128xf32>, vector<128x128xf32>, vector<8x128xf32> -> vector<8x128xf32>
    %19 = arith.addf %16, %18 : vector<8x128xf32>
    %c0_10 = arith.constant 0 : index
    %c0_11 = arith.constant 0 : index
    %20 = vector.load %arg9[%c0_10, %c0_11] : memref<8x128xf32, #tpu.memory_space<vmem>>, vector<8x128xf32>
    tpu.vector_store %arg9[%c0_10, %c0_11], %19 {strides = array<i32>} : memref<8x128xf32, #tpu.memory_space<vmem>>, vector<8x128xf32>,
    %c0_i32_12 = arith.constant 0 : i32
    %21 = arith.cmpi eq, %arg2, %c0_i32_12 : i32
    %22 = arith.extui %21 : i1 to i32
    %c0_i32_13 = arith.constant 0 : i32
    %23 = arith.cmpi ne, %22, %c0_i32_13 : i32
    scf.if %23 {
      %c0_14 = arith.constant 0 : index
      %c0_15 = arith.constant 0 : index
      %24 = vector.load %arg9[%c0_14, %c0_15] : memref<8x128xf32, #tpu.memory_space<vmem>>, vector<8x128xf32>
      %c0_16 = arith.constant 0 : index
      %c0_17 = arith.constant 0 : index
      %25 = vector.load %arg7[%c0_16, %c0_17] : memref<1x128xf32, #tpu.memory_space<vmem>>, vector<1x128xf32>
      %26 = vector.broadcast %25 : vector<1x128xf32> to vector<8x128xf32>
      %27 = arith.addf %24, %26 : vector<8x128xf32>
      %c0_18 = arith.constant 0 : index
      %c0_19 = arith.constant 0 : index
      %28 = vector.load %arg8[%c0_18, %c0_19] : memref<8x128xf32, #tpu.memory_space<vmem>>, vector<8x128xf32>
      tpu.vector_store %arg8[%c0_18, %c0_19], %27 {strides = array<i32>} : memref<8x128xf32, #tpu.memory_space<vmem>>, vector<8x128xf32>,
    } else {
    }
    return
  }
  func.func @transform_0(%arg0: i32, %arg1: i32, %arg2: i32, %arg3: memref<1xf32, #tpu.memory_space<smem>>) -> (i32, i32) {
    %c0_i32 = arith.constant 0 : i32
    return %arg0, %arg2 : i32, i32
  }
  func.func @transform_1(%arg0: i32, %arg1: i32, %arg2: i32, %arg3: memref<1xf32, #tpu.memory_space<smem>>) -> (i32, i32) {
    %c0_i32 = arith.constant 0 : i32
    return %arg2, %arg1 : i32, i32
  }
  func.func @transform_2(%arg0: i32, %arg1: i32, %arg2: i32, %arg3: memref<1xf32, #tpu.memory_space<smem>>) -> (i32, i32) {
    %c0_i32 = arith.constant 0 : i32
    return %arg2, %arg1 : i32, i32
  }
  func.func @transform_3(%arg0: i32, %arg1: i32, %arg2: i32, %arg3: memref<1xf32, #tpu.memory_space<smem>>) -> (i32, i32) {
    %c0_i32 = arith.constant 0 : i32
    %c0_i32_0 = arith.constant 0 : i32
    return %c0_i32, %arg1 : i32, i32
  }
  func.func @transform_4(%arg0: i32, %arg1: i32, %arg2: i32, %arg3: memref<1xf32, #tpu.memory_space<smem>>) -> (i32, i32) {
    %c0_i32 = arith.constant 0 : i32
    return %arg0, %arg1 : i32, i32
  }
}

</mosaic_0001>

<bundles_post_ra>
// kernel: tpu_custom_call.1
= control target key start
LH: loop header
LB: loop body
LE: loop exit
PB: predicated region body
PF: predicated region fallthrough
CT: control target
= control target key end

     0   :  { %11 = vsyncpa [#allocation6], 0  ;;  %s746_s0 = inlined_call_operand.<no memory space> [shape: f32[1], index: 0, kind: input, shape index: {}]   ;;  %s747_s1 = inlined_call_operand.hbm [shape: f32[8,128], index: 1, kind: input, shape index: {}]   ;;  %s748_s2 = inlined_call_operand.hbm [shape: f32[128,128], index: 2, kind: input, shape index: {}]   ;;  %s749_s3 = inlined_call_operand.hbm [shape: f32[128,128], index: 3, kind: input, shape index: {}]   ;;  %s750_s4 = inlined_call_operand.vmem [shape: f32[1,128], index: 4, kind: input, shape index: {}]   ;;  %s751_s5 = inlined_call_operand.hbm [shape: f32[8,128], index: 5, kind: output, shape index: {}]  }
   0x1   :  { %12 = vsyncpa [#allocation9], 0 }
   0x2   :  { %13 = vsyncpa [#allocation7], 0  ;;  %s605_s18 = smov [#allocation8]   ;;  %s511_s22 = scalar_lea.hbm %s748_s2, 2048 }
   0x3   :  { %s29_s19 = sshll.u32 %s605_s18, 4  ;;  %p512_p0 = scmp.ne.s32.totalorder %s748_s2, %s511_s22  ;;  %s30_s19 = int_to_ptr.vmem [resolvable:$true] %s29_s19 }
   0x4   :  { %p515_p1 = scmp.lt.u32.totalorder %s511_s22, %s748_s2 }
   0x6   :  { %p517_p2 = pnand %p515_p1, %p512_p0 }
   0x8   :  { %520 = shalt.err (!%p517_p2)
}
   0x9   :  { %s521_s27 = scalar_lea.vmem %s30_s19, 2048  ;;  %p526_p4 = scmp.lt.s32.totalorder %s30_s19, %s30_s19 }
   0xa   :  { %p522_p3 = scmp.ne.s32.totalorder %s30_s19, %s521_s27  ;;  %p527_p5 = scmp.lt.s32.totalorder %s521_s27, %s521_s27 }
   0xc   :  { %p528_p6 = por %p527_p5, %p526_p4 }
   0xe   :  { %p529_p7 = pnand %p528_p6, %p522_p3 }
  0x10   :  { %532 = shalt.err (!%p529_p7)
}
  0x11   :  { %s606_s28 = smov 128   ;;  %s607_s29 = smov 8  }
  0x12   :  { %35 = dma.hbm_to_vmem [thread:$0]  %s748_s2, 2048, %s30_s19, [#allocation9], %s606_s28, %s606_s28, %s607_s29  }
  0x13   :  { %s608_s7 = smov [#allocation5]   ;;  %s609_s9 = smov [#allocation10]  }
  0x14   :  { %s20_s8 = sshll.u32 %s608_s7, 4  ;;  %s41_s10 = sshll.u32 %s609_s9, 4  ;;  %s21_s8 = int_to_ptr.vmem [resolvable:$true] %s20_s8  ;;  %s42_s10 = int_to_ptr.vmem [resolvable:$true] %s41_s10 }
  0x15   :  { %s533_s13 = scalar_lea.hbm %s747_s1, 128 }
  0x16   :  { %p534_p8 = scmp.ne.s32.totalorder %s747_s1, %s533_s13  ;;  %p537_p9 = scmp.lt.u32.totalorder %s533_s13, %s747_s1 }
  0x18   :  { %p539_p10 = pnand %p537_p9, %p534_p8 }
  0x1a   :  { %542 = shalt.err (!%p539_p10)
}
  0x1b   :  { %s543_s2 = scalar_lea.vmem %s21_s8, 128  ;;  %p548_p12 = scmp.lt.s32.totalorder %s21_s8, %s21_s8 }
  0x1c   :  { %p544_p11 = scmp.ne.s32.totalorder %s21_s8, %s543_s2  ;;  %p549_p13 = scmp.lt.s32.totalorder %s543_s2, %s543_s2 }
  0x1e   :  { %p550_p0 = por %p549_p13, %p548_p12 }
  0x20   :  { %p551_p1 = pnand %p550_p0, %p544_p11 }
  0x22   :  { %554 = shalt.err (!%p551_p1)
}
  0x23   :  { %23 = dma.hbm_to_vmem [thread:$0]  %s747_s1, 128, %s21_s8, [#allocation6]  }
  0x24   :  { %s555_s22 = scalar_lea.hbm %s749_s3, 2048 }
  0x25   :  { %p556_p2 = scmp.ne.s32.totalorder %s749_s3, %s555_s22  ;;  %p559_p3 = scmp.lt.u32.totalorder %s555_s22, %s749_s3 }
  0x27   :  { %p561_p4 = pnand %p559_p3, %p556_p2 }
  0x29   :  { %564 = shalt.err (!%p561_p4)
}
  0x2a   :  { %s565_s27 = scalar_lea.vmem %s42_s10, 2048  ;;  %p570_p6 = scmp.lt.s32.totalorder %s42_s10, %s42_s10 }
  0x2b   :  { %p566_p5 = scmp.ne.s32.totalorder %s42_s10, %s565_s27  ;;  %p571_p7 = scmp.lt.s32.totalorder %s565_s27, %s565_s27 }
  0x2d   :  { %p572_p8 = por %p571_p7, %p570_p6 }
  0x2f   :  { %p573_p9 = pnand %p572_p8, %p566_p5 }
  0x31   :  { %576 = shalt.err (!%p573_p9)
}
  0x32   :  { %47 = dma.hbm_to_vmem [thread:$0]  %s749_s3, 2048, %s42_s10, [#allocation9], %s606_s28, %s606_s28, %s607_s29  }
  0x33   :  { %599 = dma.done.wait [#allocation6], 128  }
  0x34   :  { %600 = vsyncadd [#allocation6], 4294967168 }
  0x35   :  { %601 = dma.done.wait [#allocation9], 4096  }
  0x36   :  { %602 = vsyncadd [#allocation9], 4294963200  ;;  %v610_v0 = vmov 0.0|0.0   ;;  %vm611_vm0 = vmmov 0   ;;  %v612_v1 = vmov 0.0   ;;  %v65_v2 = vld [vmem:[#allocation10] sm:$0xff]  ;;  %v690_v43 = vstv %s746_s0 }
  0x37   :  { %414 = vmatprep.subr.bf16.mxu0 %v610_v0  ;;  %411 = vmatprep.mubr.msk.f32.mxu0 %vm611_vm0, %v612_v1  ;;  %v66_v3 = vld [vmem:[#allocation10 + $0x8] sm:$0xff]  ;;  %v345_v4 = vmul.f32 -1.442695, %v65_v2  ;;  %v67_v6 = vld [vmem:[#allocation10 + $0x10] sm:$0xff]  ;;  %v68_v7 = vld [vmem:[#allocation10 + $0x18] sm:$0xff]  ;;  %s613_s6 = smov [#allocation11]  }
  0x38   :  { %v346_v5 = vmul.f32 -1.442695, %v66_v3  ;;  %v347_v8 = vmul.f32 -1.442695, %v67_v6  ;;  %v348_v9 = vmul.f32 -1.442695, %v68_v7 }
  0x39   :  { %447 = vpow2.f32 %v345_v4  ;;  %v69_v10 = vld [vmem:[#allocation10 + $0x20] sm:$0xff]  ;;  %v70_v11 = vld [vmem:[#allocation10 + $0x28] sm:$0xff]  ;;  %v71_v14 = vld [vmem:[#allocation10 + $0x30] sm:$0xff]  ;;  %s335_s7 = sshll.u32 %s613_s6, 4  ;;  %s336_s7 = int_to_ptr.vmem [resolvable:$true] %s335_s7 }
  0x3a   :  { %449 = vpow2.f32 %v346_v5  ;;  %v349_v12 = vmul.f32 -1.442695, %v69_v10  ;;  %v350_v13 = vmul.f32 -1.442695, %v70_v11  ;;  %v72_v15 = vld [vmem:[#allocation10 + $0x38] sm:$0xff]  ;;  %v73_v18 = vld [vmem:[#allocation10 + $0x40] sm:$0xff]  ;;  %p582_p11 = scmp.lt.s32.totalorder %s336_s7, %s336_s7 }
  0x3b   :  { %451 = vpow2.f32 %v347_v8  ;;  %v351_v16 = vmul.f32 -1.442695, %v71_v14  ;;  %v352_v17 = vmul.f32 -1.442695, %v72_v15  ;;  %v74_v19 = vld [vmem:[#allocation10 + $0x48] sm:$0xff]  ;;  %v75_v21 = vld [vmem:[#allocation10 + $0x50] sm:$0xff] }
  0x3c   :  { %453 = vpow2.f32 %v348_v9  ;;  %v353_v20 = vmul.f32 -1.442695, %v73_v18  ;;  %v354_v22 = vmul.f32 -1.442695, %v74_v19  ;;  %v76_v23 = vld [vmem:[#allocation10 + $0x58] sm:$0xff]  ;;  %v77_v25 = vld [vmem:[#allocation10 + $0x60] sm:$0xff] }
  0x3d   :  { %455 = vpow2.f32 %v349_v12  ;;  %v355_v24 = vmul.f32 -1.442695, %v75_v21  ;;  %v356_v26 = vmul.f32 -1.442695, %v76_v23  ;;  %v357_v27 = vmul.f32 -1.442695, %v77_v25 }
  0x3e   :  { %457 = vpow2.f32 %v350_v13  ;;  %v177_v42 = vld [vmem:[#allocation8] sm:$0xff]  ;;  %v178_v46 = vld [vmem:[#allocation8 + $0x8] sm:$0xff]  ;;  %v179_v50 = vld [vmem:[#allocation8 + $0x10] sm:$0xff]  ;;  %s577_s8 = scalar_lea.vmem %s336_s7, 128 }
  0x3f   :  { %459 = vpow2.f32 %v351_v16  ;;  %v78_v48 = vld [vmem:[#allocation10 + $0x68] sm:$0xff]  ;;  %v194_v53 = vsub.f32 %v177_v42, %v690_v43  ;;  %v180_v54 = vld [vmem:[#allocation8 + $0x18] sm:$0xff]  ;;  %v79_v56 = vld [vmem:[#allocation10 + $0x70] sm:$0xff]  ;;  %v195_v58 = vsub.f32 %v178_v46, %v690_v43  ;;  %v196_v1 = vsub.f32 %v179_v50, %v690_v43  ;;  %p578_p10 = scmp.ne.s32.totalorder %s336_s7, %s577_s8  ;;  %p583_p12 = scmp.lt.s32.totalorder %s577_s8, %s577_s8 }
  0x40   :  { %461 = vpow2.f32 %v352_v17  ;;  %v181_v59 = vld [vmem:[#allocation8 + $0x20] sm:$0xff]  ;;  %v358_v61 = vmul.f32 -1.442695, %v78_v48  ;;  %v80_v62 = vld [vmem:[#allocation10 + $0x78] sm:$0xff]  ;;  %v182_v2 = vld [vmem:[#allocation8 + $0x28] sm:$0xff]  ;;  %v197_v5 = vsub.f32 %v180_v54, %v690_v43 }
  0x41   :  { %463 = vpow2.f32 %v353_v20  ;;  %v183_v6 = vld [vmem:[#allocation8 + $0x30] sm:$0xff]  ;;  %v359_v7 = vmul.f32 -1.442695, %v79_v56  ;;  %v198_v10 = vsub.f32 %v181_v59, %v690_v43  ;;  %v184_v11 = vld [vmem:[#allocation8 + $0x38] sm:$0xff]  ;;  %v360_v12 = vmul.f32 -1.442695, %v80_v62  ;;  %p584_p13 = por %p583_p12, %p582_p11 }
  0x42   :  { %465 = vpow2.f32 %v354_v22  ;;  %v199_v15 = vsub.f32 %v182_v2, %v690_v43  ;;  %v200_v19 = vsub.f32 %v183_v6, %v690_v43  ;;  %v201_v23 = vsub.f32 %v184_v11, %v690_v43  ;;  %v186_v25 = vld [vmem:[#allocation8 + $0x48] sm:$0xff]  ;;  %v189_v62 = vld [vmem:[#allocation8 + $0x60] sm:$0xff]  ;;  %v191_v11 = vld [vmem:[#allocation8 + $0x70] sm:$0xff] }
  0x43   :  { %v448_v28 = vpop.eup %447  ;;  %467 = vpow2.f32 %v355_v24  ;;  %v185_v24 = vld [vmem:[#allocation8 + $0x40] sm:$0xff]  ;;  %p585_p0 = pnand %p584_p13, %p578_p10 }
  0x44   :  { %v450_v29 = vpop.eup %449  ;;  %v129_v30 = vadd.f32 1.0, %v448_v28  ;;  %469 = vpow2.f32 %v356_v26 }
  0x45   :  { %v452_v31 = vpop.eup %451  ;;  %v130_v32 = vadd.f32 1.0, %v450_v29  ;;  %471 = vpow2.f32 %v357_v27 }
  0x46   :  { %v454_v33 = vpop.eup %453  ;;  %473 = vrcp.f32 %v129_v30  ;;  %v131_v34 = vadd.f32 1.0, %v452_v31 }
  0x47   :  { %v456_v35 = vpop.eup %455  ;;  %475 = vrcp.f32 %v130_v32  ;;  %v132_v36 = vadd.f32 1.0, %v454_v33 }
  0x48   :  { %v458_v37 = vpop.eup %457  ;;  %477 = vrcp.f32 %v131_v34  ;;  %v133_v38 = vadd.f32 1.0, %v456_v35 }
  0x49   :  { %v460_v39 = vpop.eup %459  ;;  %479 = vrcp.f32 %v132_v36  ;;  %v134_v40 = vadd.f32 1.0, %v458_v37  ;;  %v202_v36 = vsub.f32 %v185_v24, %v690_v43  ;;  %v203_v37 = vsub.f32 %v186_v25, %v690_v43 }
  0x4a   :  { %v462_v41 = vpop.eup %461  ;;  %481 = vrcp.f32 %v133_v38  ;;  %v135_v44 = vadd.f32 1.0, %v460_v39 }
  0x4b   :  { %v464_v45 = vpop.eup %463  ;;  %483 = vrcp.f32 %v134_v40  ;;  %v136_v47 = vadd.f32 1.0, %v462_v41 }
  0x4c   :  { %v466_v49 = vpop.eup %465  ;;  %485 = vrcp.f32 %v135_v44  ;;  %v137_v51 = vadd.f32 1.0, %v464_v45  ;;  %v187_v44 = vld [vmem:[#allocation8 + $0x50] sm:$0xff]  ;;  %v188_v45 = vld [vmem:[#allocation8 + $0x58] sm:$0xff] }
  0x4d   :  { %v468_v52 = vpop.eup %467  ;;  %487 = vrcp.f32 %v136_v47  ;;  %v138_v55 = vadd.f32 1.0, %v466_v49  ;;  %v204_v49 = vsub.f32 %v187_v44, %v690_v43  ;;  %v205_v50 = vsub.f32 %v188_v45, %v690_v43 }
  0x4e   :  { %v470_v57 = vpop.eup %469  ;;  %489 = vrcp.f32 %v137_v51  ;;  %v139_v60 = vadd.f32 1.0, %v468_v52 }
  0x4f   :  { %v472_v63 = vpop.eup %471  ;;  %491 = vrcp.f32 %v138_v55  ;;  %v140_v3 = vadd.f32 1.0, %v470_v57 }
  0x50   :  { %v474_v4 = vpop.eup %473  ;;  %493 = vrcp.f32 %v139_v60  ;;  %v141_v29 = vadd.f32 1.0, %v472_v63 }
  0x51   :  { %v476_v8 = vpop.eup %475  ;;  %v210_v9 = vmul.f32 %v474_v4, %v194_v53  ;;  %495 = vpow2.f32 %v358_v61 }
  0x52   :  { %v478_v13 = vpop.eup %477  ;;  %v211_v14 = vmul.f32 %v476_v8, %v195_v58  ;;  %497 = vrcp.f32 %v140_v3 }
  0x53   :  { %v480_v16 = vpop.eup %479  ;;  %v226_v17 = vadd.f32 %v210_v9, %v690_v43  ;;  %v212_v18 = vmul.f32 %v478_v13, %v196_v1  ;;  %499 = vpow2.f32 %v359_v7  ;;  %v190_v7 = vld [vmem:[#allocation8 + $0x68] sm:$0xff] }
  0x54   :  { %v482_v20 = vpop.eup %481  ;;  %v227_v21 = vadd.f32 %v211_v14, %v690_v43  ;;  %v213_v22 = vmul.f32 %v480_v16, %v197_v5  ;;  %501 = vpow2.f32 %v360_v12  ;;  %v206_v5 = vsub.f32 %v189_v62, %v690_v43  ;;  %v192_v14 = vld [vmem:[#allocation8 + $0x78] sm:$0xff] }
  0x55   :  { %v484_v26 = vpop.eup %483  ;;  %v228_v27 = vadd.f32 %v212_v18, %v690_v43  ;;  %v214_v28 = vmul.f32 %v482_v20, %v198_v10  ;;  %503 = vrcp.f32 %v141_v29  ;;  %v207_v12 = vsub.f32 %v190_v7, %v690_v43 }
  0x56   :  { %v486_v30 = vpop.eup %485  ;;  %v415_v31 = vpack.c.bf16 %v227_v21, %v226_v17  ;;  %v229_v32 = vadd.f32 %v213_v22, %v690_v43  ;;  %v215_v33 = vmul.f32 %v484_v26, %v199_v15  ;;  %v208_v16 = vsub.f32 %v191_v11, %v690_v43 }
  0x57   :  { %v488_v34 = vpop.eup %487  ;;  %v230_v35 = vadd.f32 %v214_v28, %v690_v43  ;;  %v216_v41 = vmul.f32 %v486_v30, %v200_v19  ;;  %v209_v18 = vsub.f32 %v192_v14, %v690_v43  ;;  %v243_v30 = vld [vmem:[#allocation5] sm:$0xff] }
  0x58   :  { %v490_v38 = vpop.eup %489  ;;  %416 = vmatpush3.bf16.msra.mxu0 %v415_v31  ;;  %v418_v39 = vpack.c.bf16 %v229_v32, %v228_v27  ;;  %v231_v40 = vadd.f32 %v215_v33, %v690_v43  ;;  %v217_v42 = vmul.f32 %v488_v34, %v201_v23  ;;  %v361_v31 = vld [vmem:[%s750_s4] ss:$0 sm:$0xff] }
  0x59   :  { %v492_v46 = vpop.eup %491  ;;  %417 = vmatprep.subr.bf16.mxu0 %v610_v0  ;;  %v218_v48 = vmul.f32 %v490_v38, %v202_v36  ;;  %v232_v53 = vadd.f32 %v216_v41, %v690_v43 }
  0x5a   :  { %v494_v47 = vpop.eup %493  ;;  %v421_v52 = vpack.c.bf16 %v231_v40, %v230_v35  ;;  %v233_v54 = vadd.f32 %v217_v42, %v690_v43  ;;  %v219_v55 = vmul.f32 %v492_v46, %v203_v37 }
  0x5b   :  { %v496_v51 = vpop.eup %495  ;;  %v234_v60 = vadd.f32 %v218_v48, %v690_v43  ;;  %v220_v61 = vmul.f32 %v494_v47, %v204_v49 }
  0x5c   :  { %419 = vmatpush3.bf16.msra.mxu0 %v418_v39  ;;  %v498_v56 = vpop.eup %497  ;;  %v142_v57 = vadd.f32 1.0, %v496_v51  ;;  %v424_v1 = vpack.c.bf16 %v233_v54, %v232_v53  ;;  %v235_v2 = vadd.f32 %v219_v55, %v690_v43 }
  0x5d   :  { %420 = vmatprep.subr.bf16.mxu0 %v610_v0  ;;  %v500_v58 = vpop.eup %499  ;;  %v221_v3 = vmul.f32 %v498_v56, %v205_v50  ;;  %v236_v9 = vadd.f32 %v220_v61, %v690_v43 }
  0x5e   :  { %v502_v59 = vpop.eup %501  ;;  %505 = vrcp.f32 %v142_v57  ;;  %v143_v63 = vadd.f32 1.0, %v500_v58  ;;  %v427_v8 = vpack.c.bf16 %v235_v2, %v234_v60 }
  0x5f   :  { %v144_v4 = vadd.f32 1.0, %v502_v59  ;;  %v504_v6 = vpop.eup %503  ;;  %v237_v10 = vadd.f32 %v221_v3, %v690_v43 }
  0x60   :  { %422 = vmatpush3.bf16.msra.mxu0 %v421_v52  ;;  %507 = vrcp.f32 %v143_v63  ;;  %v222_v13 = vmul.f32 %v504_v6, %v206_v5 }
  0x61   :  { %423 = vmatprep.subr.bf16.mxu0 %v610_v0  ;;  %509 = vrcp.f32 %v144_v4  ;;  %v430_v15 = vpack.c.bf16 %v237_v10, %v236_v9 }
  0x62   :  { %v238_v20 = vadd.f32 %v222_v13, %v690_v43 }
  0x64   :  { %425 = vmatpush3.bf16.msra.mxu0 %v424_v1 }
  0x65   :  { %426 = vmatprep.subr.bf16.mxu0 %v610_v0 }
  0x68   :  { %428 = vmatpush3.bf16.msra.mxu0 %v427_v8  ;;  %v506_v17 = vpop.eup %505 }
  0x69   :  { %429 = vmatprep.subr.bf16.mxu0 %v610_v0  ;;  %v223_v19 = vmul.f32 %v506_v17, %v207_v12 }
  0x6a   :  { %v508_v21 = vpop.eup %507 }
  0x6b   :  { %v510_v22 = vpop.eup %509  ;;  %v239_v23 = vadd.f32 %v223_v19, %v690_v43  ;;  %v224_v24 = vmul.f32 %v508_v21, %v208_v16 }
  0x6c   :  { %431 = vmatpush3.bf16.msra.mxu0 %v430_v15  ;;  %v225_v25 = vmul.f32 %v510_v22, %v209_v18 }
  0x6d   :  { %432 = vmatprep.subr.bf16.mxu0 %v610_v0  ;;  %v433_v26 = vpack.c.bf16 %v239_v23, %v238_v20  ;;  %v240_v27 = vadd.f32 %v224_v24, %v690_v43 }
  0x6e   :  { %v241_v28 = vadd.f32 %v225_v25, %v690_v43 }
  0x70   :  { %434 = vmatpush3.bf16.msra.mxu0 %v433_v26  ;;  %v436_v29 = vpack.c.bf16 %v241_v28, %v240_v27 }
  0x71   :  { %435 = vmatprep.subr.bf16.mxu0 %v610_v0 }
  0x74   :  { %437 = vmatpush3.bf16.msra.mxu0 %v436_v29 }
  0x77   :  { %412 = vmatmul.mubr.f32.vlgmr.msra.gmra.mrb[0].mxu0 %v243_v30 }
 0x14a   :  { %v310_v32 = vpop.f32.mrb[0].mxu0 }
 0x14b   :  { %v327_v33 = vadd.f32 %v361_v31, %v310_v32  ;;  %v413_v34 = vpop.f32.mrb[1].mxu0 }
 0x14d   :  { %328 = vst [vmem:[#allocation11] sm:$0xff] %v327_v33 }
 0x14e   :  { %588 = shalt.err (!%p585_p0)
}
 0x14f   :  { %s589_s11 = scalar_lea.hbm %s751_s5, 128 }
 0x150   :  { %p590_p1 = scmp.ne.s32.totalorder %s751_s5, %s589_s11  ;;  %p593_p2 = scmp.lt.u32.totalorder %s589_s11, %s751_s5 }
 0x152   :  { %p595_p3 = pnand %p593_p2, %p590_p1 }
 0x154   :  { %598 = shalt.err (!%p595_p3)
}
 0x155   :  { %338 = dma.vmem_to_hbm [thread:$0]  %s336_s7, 128, %s751_s5, [#allocation7]  }
 0x156   :  { %603 = dma.done.wait [#allocation7], 128  }
 0x157   :  { %604 = vsyncadd [#allocation7], 4294967168 }
 0x158   :  { %342 = vsyncpa [#allocation6], 1 }
 0x159   :  { %343 = vsyncpa [#allocation9], 1 }
 0x15a   :  { %344 = vsyncpa [#allocation7], 1 }

</bundles_post_ra>
